<compile_context>
chip_gen: v5e
topology: v5e:2x2
jax: 0.10.0
libtpu: 0.0.40
codegen_flags: <defaults>
</compile_context>

<pallas_src>
import functools

import jax
import jax.numpy as jnp
from jax.experimental import pallas as pl
from jax.experimental.pallas import tpu as pltpu


# ----------------------------- Pallas kernel --------------------------------

def gcn2_fused_kernel(x_ref, adj_ref, w1_ref, b1_ref, w2_ref, b2_ref, o_ref):
    """Fused 2-layer GCN for one graph (one grid step); all operands in VMEM.

    x_ref:(n,nfeat) bf16, adj_ref:(n,n) bf16, w*_ref bf16, b*_ref f32 (1,nhid).
    bf16 MXU path with f32 accumulation; bias add + relu in f32.
    """
    adj = adj_ref[...]                                                   # (n, n)
    # layer 1: relu(adj @ (x @ W1) + b1)
    s1 = jnp.dot(x_ref[...], w1_ref[...], preferred_element_type=jnp.float32)
    h1 = jnp.maximum(
        jnp.dot(adj, s1.astype(jnp.bfloat16), preferred_element_type=jnp.float32)
        + b1_ref[...], 0.0)
    # TODO(synk): training-mode dropout (F.dropout, training=True) is not modeled;
    #             inference mode == identity.
    # layer 2: relu(adj @ (h1 @ W2) + b2)
    s2 = jnp.dot(h1.astype(jnp.bfloat16), w2_ref[...],
                 preferred_element_type=jnp.float32)
    o_ref[...] = jnp.maximum(
        jnp.dot(adj, s2.astype(jnp.bfloat16), preferred_element_type=jnp.float32)
        + b2_ref[...], 0.0)


def _gcn2_pallas(xb, adjb, w1, b1, w2, b2):
    """Batched fused 2-layer GCN.  xb:(G,n,nfeat) bf16, adjb:(G,n,n) bf16."""
    G, n, nfeat = xb.shape
    nhid = w1.shape[1]

    flops = int(G) * (2 * n * nfeat * nhid + 2 * n * nhid * nhid
                      + 4 * n * n * nhid)
    bytes_accessed = (xb.size * 2 + adjb.size * 2 + w1.size * 2 + w2.size * 2
                      + b1.size * 4 + b2.size * 4 + G * n * nhid * 4)

    return pl.pallas_call(
        gcn2_fused_kernel,
        out_shape=jax.ShapeDtypeStruct((G, n, nhid), jnp.float32),
        grid_spec=pltpu.PrefetchScalarGridSpec(
            num_scalar_prefetch=0,
            grid=(G,),
            in_specs=[
                # per-graph blocks (leading graph dim squeezed out)
                pl.BlockSpec((None, n, nfeat), lambda g: (g, 0, 0)),   # x
                pl.BlockSpec((None, n, n),     lambda g: (g, 0, 0)),   # adj
                # weights / biases resident across the whole grid
                pl.BlockSpec((nfeat, nhid),    lambda g: (0, 0)),      # W1
                pl.BlockSpec((1, nhid),        lambda g: (0, 0)),      # b1
                pl.BlockSpec((nhid, nhid),     lambda g: (0, 0)),      # W2
                pl.BlockSpec((1, nhid),        lambda g: (0, 0)),      # b2
            ],
            out_specs=pl.BlockSpec((None, n, nhid), lambda g: (g, 0, 0)),
        ),
        compiler_params=pltpu.CompilerParams(
            # graphs are independent -> shard across v7x's two TensorCores
            dimension_semantics=("parallel",)),
        cost_estimate=pl.CostEstimate(flops=flops, transcendentals=0,
                                      bytes_accessed=bytes_accessed),
    )(xb, adjb, w1, b1, w2, b2)


# ----------------------------- wrappers ---------------------------------------

def _cast_params(params):
    w1 = params["w1"].astype(jnp.bfloat16)
    w2 = params["w2"].astype(jnp.bfloat16)
    b1 = params["b1"].reshape(1, -1).astype(jnp.float32)
    b2 = params["b2"].reshape(1, -1).astype(jnp.float32)
    return w1, b1, w2, b2


@functools.partial(jax.jit, static_argnames=("pad_n",))
def gcn_encoder_forward(params, x, adj, pad_n, pos_idx):
    """GCNEncoder.forward (eval).  x:(n,nfeat) f32, adj:(n,n) f32 -> (pad_n,nhid)."""
    nhid = params["w1"].shape[1]
    w1, b1, w2, b2 = _cast_params(params)
    h = _gcn2_pallas(x.astype(jnp.bfloat16)[None],
                     adj.astype(jnp.bfloat16)[None],
                     w1, b1, w2, b2)[0]                       # (n, nhid) f32
    out = jnp.zeros((pad_n, nhid), jnp.float32)
    # row scatter (index glue); pos_idx unique -> matches torch assignment
    return out.at[pos_idx].set(h, unique_indices=True)


@functools.partial(jax.jit, static_argnames=("pad_n",))
def gcn_encoder_forward_batched(params, x, adj, pad_n, pos_idx):
    """Batched forward: x:(G,n,nfeat), adj:(G,n,n), pos_idx:(G,n) -> (G,pad_n,nhid).

    One pallas_call for all G graphs (fills the MXU M dim / amortizes launch).
    """
    G = x.shape[0]
    nhid = params["w1"].shape[1]
    w1, b1, w2, b2 = _cast_params(params)
    h = _gcn2_pallas(x.astype(jnp.bfloat16), adj.astype(jnp.bfloat16),
                     w1, b1, w2, b2)                          # (G, n, nhid) f32
    out = jnp.zeros((G, pad_n, nhid), jnp.float32)
    return jax.vmap(
        lambda o, idx, hh: o.at[idx].set(hh, unique_indices=True)
    )(out, pos_idx, h)


# ----------------------------- reference (pure JAX, f32) ----------------------

def gcn_encoder_ref(params, x, adj, pad_n, pos_idx):
    h = jnp.maximum(adj @ (x @ params["w1"]) + params["b1"], 0.0)
    h = jnp.maximum(adj @ (h @ params["w2"]) + params["b2"], 0.0)
    return jnp.zeros((pad_n, h.shape[1]), jnp.float32).at[pos_idx].set(h)


# ----------------------------------- main -------------------------------------

if __name__ == "__main__":
    n = 24          # nodes per graph
    nfeat = 32
    nhid = 32
    pad_n = 40      # padded node count
    G = 4           # graphs per batched pallas_call

    key = jax.random.PRNGKey(0)
    k_w1, k_b1, k_w2, k_b2 = jax.random.split(key, 4)
    params = {
        "w1": 0.2 * jax.random.normal(k_w1, (nfeat, nhid), jnp.float32),
        "b1": 0.1 * jax.random.normal(k_b1, (nhid,), jnp.float32),
        "w2": 0.2 * jax.random.normal(k_w2, (nhid, nhid), jnp.float32),
        "b2": 0.1 * jax.random.normal(k_b2, (nhid,), jnp.float32),
    }

    # G deterministic graphs (features, row-normalized adjacency, scatter rows)
    xs, adjs, idxs = [], [], []
    for gk in jax.random.split(jax.random.PRNGKey(1), G):
        k_x, k_a, k_p = jax.random.split(gk, 3)
        xs.append(jax.random.normal(k_x, (n, nfeat), jnp.float32))
        a = (jax.random.uniform(k_a, (n, n)) > 0.5).astype(jnp.float32)
        a = a + jnp.eye(n, dtype=jnp.float32)
        adjs.append(a / jnp.sum(a, axis=1, keepdims=True))
        idxs.append(jax.random.permutation(k_p, pad_n)[:n])
    xs, adjs, idxs = jnp.stack(xs), jnp.stack(adjs), jnp.stack(idxs)

    # ---- single-graph forward (module semantics) ----
    out = gcn_encoder_forward(params, xs[0], adjs[0], pad_n=pad_n, pos_idx=idxs[0])
    jax.block_until_ready(out)
    assert out.shape == (pad_n, nhid)
    assert jnp.all(jnp.isfinite(out))
    ref = gcn_encoder_ref(params, xs[0], adjs[0], pad_n, idxs[0])
    assert jnp.allclose(out, ref, rtol=2e-2, atol=1e-2), \
        "single-graph mismatch vs pure-JAX reference"

    # ---- batched forward (G graphs in one pallas_call, parallel grid axis) ----
    out_b = gcn_encoder_forward_batched(params, xs, adjs, pad_n=pad_n, pos_idx=idxs)
    jax.block_until_ready(out_b)
    assert out_b.shape == (G, pad_n, nhid)
    ref_b = jnp.stack([gcn_encoder_ref(params, xs[g], adjs[g], pad_n, idxs[g])
                       for g in range(G)])
    assert jnp.all(jnp.isfinite(out_b))
    assert jnp.allclose(out_b, ref_b, rtol=2e-2, atol=1e-2), \
        "batched mismatch vs pure-JAX reference"

    print("KERNEL_OK")
</pallas_src>

<mosaic_0001>
module attributes {stable_mosaic.version = 11 : i64} {
  func.func @gcn2_fused_kernel(%arg0: i32, %arg1: memref<1x24x32xbf16, #tpu.memory_space<vmem>>, %arg2: memref<1x24x24xbf16, #tpu.memory_space<vmem>>, %arg3: memref<32x32xbf16, #tpu.memory_space<vmem>>, %arg4: memref<1x32xf32, #tpu.memory_space<vmem>>, %arg5: memref<32x32xbf16, #tpu.memory_space<vmem>>, %arg6: memref<1x32xf32, #tpu.memory_space<vmem>>, %arg7: memref<1x24x32xf32, #tpu.memory_space<vmem>>) attributes {dimension_semantics = [#tpu.dimension_semantics<parallel>], iteration_bounds = array<i64: 1>, scalar_prefetch = 0 : i64, scratch_operands = 0 : i64, tpu.core_type = #tpu.core_type<tc>, window_params = [{transform_indices = @transform_0, window_bounds = array<i64: 1, 24, 32>}, {transform_indices = @transform_1, window_bounds = array<i64: 1, 24, 24>}, {pipeline_mode = #tpu.pipeline_mode<synchronous>, transform_indices = @transform_2, window_bounds = array<i64: 32, 32>}, {pipeline_mode = #tpu.pipeline_mode<synchronous>, transform_indices = @transform_3, window_bounds = array<i64: 1, 32>}, {pipeline_mode = #tpu.pipeline_mode<synchronous>, transform_indices = @transform_4, window_bounds = array<i64: 32, 32>}, {pipeline_mode = #tpu.pipeline_mode<synchronous>, transform_indices = @transform_5, window_bounds = array<i64: 1, 32>}, {transform_indices = @transform_6, window_bounds = array<i64: 1, 24, 32>}]} {
    %c0 = arith.constant 0 : index
    %c0_0 = arith.constant 0 : index
    %c0_1 = arith.constant 0 : index
    %0 = vector.load %arg2[%c0, %c0_0, %c0_1] : memref<1x24x24xbf16, #tpu.memory_space<vmem>>, vector<1x24x24xbf16>
    %1 = vector.shape_cast %0 : vector<1x24x24xbf16> to vector<24x24xbf16>
    %c0_2 = arith.constant 0 : index
    %c0_3 = arith.constant 0 : index
    %c0_4 = arith.constant 0 : index
    %2 = vector.load %arg1[%c0_2, %c0_3, %c0_4] : memref<1x24x32xbf16, #tpu.memory_space<vmem>>, vector<1x24x32xbf16>
    %3 = vector.shape_cast %2 : vector<1x24x32xbf16> to vector<24x32xbf16>
    %c0_5 = arith.constant 0 : index
    %c0_6 = arith.constant 0 : index
    %4 = vector.load %arg3[%c0_5, %c0_6] : memref<32x32xbf16, #tpu.memory_space<vmem>>, vector<32x32xbf16>
    %cst = arith.constant dense<0.000000e+00> : vector<24x32xf32>
    %5 = tpu.matmul %3, %4, %cst {dimension_numbers = #tpu.dot_dimension_numbers<[1], [0], [0], [1], [0, 0, 1, 1], [], []>} : vector<24x32xbf16>, vector<32x32xbf16>, vector<24x32xf32> -> vector<24x32xf32>
    %6 = arith.truncf %5 : vector<24x32xf32> to vector<24x32xbf16>
    %cst_7 = arith.constant dense<0.000000e+00> : vector<24x32xf32>
    %7 = tpu.matmul %1, %6, %cst_7 {dimension_numbers = #tpu.dot_dimension_numbers<[1], [0], [0], [1], [0, 0, 1, 1], [], []>} : vector<24x24xbf16>, vector<24x32xbf16>, vector<24x32xf32> -> vector<24x32xf32>
    %c0_8 = arith.constant 0 : index
    %c0_9 = arith.constant 0 : index
    %8 = vector.load %arg4[%c0_8, %c0_9] : memref<1x32xf32, #tpu.memory_space<vmem>>, vector<1x32xf32>
    %9 = vector.broadcast %8 : vector<1x32xf32> to vector<24x32xf32>
    %10 = arith.addf %7, %9 : vector<24x32xf32>
    %cst_10 = arith.constant 0.000000e+00 : f32
    %11 = vector.broadcast %cst_10 : f32 to vector<24x32xf32>
    %12 = arith.maximumf %10, %11 : vector<24x32xf32>
    %13 = arith.truncf %12 : vector<24x32xf32> to vector<24x32xbf16>
    %c0_11 = arith.constant 0 : index
    %c0_12 = arith.constant 0 : index
    %14 = vector.load %arg5[%c0_11, %c0_12] : memref<32x32xbf16, #tpu.memory_space<vmem>>, vector<32x32xbf16>
    %cst_13 = arith.constant dense<0.000000e+00> : vector<24x32xf32>
    %15 = tpu.matmul %13, %14, %cst_13 {dimension_numbers = #tpu.dot_dimension_numbers<[1], [0], [0], [1], [0, 0, 1, 1], [], []>} : vector<24x32xbf16>, vector<32x32xbf16>, vector<24x32xf32> -> vector<24x32xf32>
    %16 = arith.truncf %15 : vector<24x32xf32> to vector<24x32xbf16>
    %cst_14 = arith.constant dense<0.000000e+00> : vector<24x32xf32>
    %17 = tpu.matmul %1, %16, %cst_14 {dimension_numbers = #tpu.dot_dimension_numbers<[1], [0], [0], [1], [0, 0, 1, 1], [], []>} : vector<24x24xbf16>, vector<24x32xbf16>, vector<24x32xf32> -> vector<24x32xf32>
    %c0_15 = arith.constant 0 : index
    %c0_16 = arith.constant 0 : index
    %18 = vector.load %arg6[%c0_15, %c0_16] : memref<1x32xf32, #tpu.memory_space<vmem>>, vector<1x32xf32>
    %19 = vector.broadcast %18 : vector<1x32xf32> to vector<24x32xf32>
    %20 = arith.addf %17, %19 : vector<24x32xf32>
    %cst_17 = arith.constant 0.000000e+00 : f32
    %21 = vector.broadcast %cst_17 : f32 to vector<24x32xf32>
    %22 = arith.maximumf %20, %21 : vector<24x32xf32>
    %c0_18 = arith.constant 0 : index
    %c0_19 = arith.constant 0 : index
    %c0_20 = arith.constant 0 : index
    %23 = vector.load %arg7[%c0_18, %c0_19, %c0_20] : memref<1x24x32xf32, #tpu.memory_space<vmem>>, vector<1x24x32xf32>
    %24 = vector.shape_cast %23 : vector<1x24x32xf32> to vector<24x32xf32>
    %25 = vector.shape_cast %22 : vector<24x32xf32> to vector<1x24x32xf32>
    tpu.vector_store %arg7[%c0_18, %c0_19, %c0_20], %25 {strides = array<i32>} : memref<1x24x32xf32, #tpu.memory_space<vmem>>, vector<1x24x32xf32>,
    return
  }
  func.func @transform_0(%arg0: i32) -> (i32, i32, i32) {
    %c0_i32 = arith.constant 0 : i32
    %c0_i32_0 = arith.constant 0 : i32
    %c0_i32_1 = arith.constant 0 : i32
    return %arg0, %c0_i32, %c0_i32_0 : i32, i32, i32
  }
  func.func @transform_1(%arg0: i32) -> (i32, i32, i32) {
    %c0_i32 = arith.constant 0 : i32
    %c0_i32_0 = arith.constant 0 : i32
    %c0_i32_1 = arith.constant 0 : i32
    return %arg0, %c0_i32, %c0_i32_0 : i32, i32, i32
  }
  func.func @transform_2(%arg0: i32) -> (i32, i32) {
    %c0_i32 = arith.constant 0 : i32
    %c0_i32_0 = arith.constant 0 : i32
    %c0_i32_1 = arith.constant 0 : i32
    return %c0_i32, %c0_i32_0 : i32, i32
  }
  func.func @transform_3(%arg0: i32) -> (i32, i32) {
    %c0_i32 = arith.constant 0 : i32
    %c0_i32_0 = arith.constant 0 : i32
    %c0_i32_1 = arith.constant 0 : i32
    return %c0_i32, %c0_i32_0 : i32, i32
  }
  func.func @transform_4(%arg0: i32) -> (i32, i32) {
    %c0_i32 = arith.constant 0 : i32
    %c0_i32_0 = arith.constant 0 : i32
    %c0_i32_1 = arith.constant 0 : i32
    return %c0_i32, %c0_i32_0 : i32, i32
  }
  func.func @transform_5(%arg0: i32) -> (i32, i32) {
    %c0_i32 = arith.constant 0 : i32
    %c0_i32_0 = arith.constant 0 : i32
    %c0_i32_1 = arith.constant 0 : i32
    return %c0_i32, %c0_i32_0 : i32, i32
  }
  func.func @transform_6(%arg0: i32) -> (i32, i32, i32) {
    %c0_i32 = arith.constant 0 : i32
    %c0_i32_0 = arith.constant 0 : i32
    %c0_i32_1 = arith.constant 0 : i32
    return %arg0, %c0_i32, %c0_i32_0 : i32, i32, i32
  }
}

</mosaic_0001>

<bundles_post_ra>
// kernel: gcn_encoder_forward.1
= control target key start
LH: loop header
LB: loop body
LE: loop exit
PB: predicated region body
PF: predicated region fallthrough
CT: control target
= control target key end

     0   :  { %vm54_vm0 = vcmask 261120   ;;  %vm100_vm1 = vcmask 1043456   ;;  %vm93_vm2 = vcmask 195584   ;;  %s331_s2 = inlined_call_operand.vmem [shape: bf16[32,32], index: 2, kind: input, shape index: {}]   ;;  %s332_s0 = inlined_call_operand.vmem [shape: bf16[1,24,32], index: 0, kind: input, shape index: {}]   ;;  %s333_s3 = inlined_call_operand.vmem [shape: f32[1,32], index: 3, kind: input, shape index: {}]   ;;  %s334_s1 = inlined_call_operand.vmem [shape: bf16[1,24,24], index: 1, kind: input, shape index: {}]   ;;  %s335_s4 = inlined_call_operand.vmem [shape: bf16[32,32], index: 4, kind: input, shape index: {}]   ;;  %s336_s5 = inlined_call_operand.vmem [shape: f32[1,32], index: 5, kind: input, shape index: {}]   ;;  %s337_s6 = inlined_call_operand.vmem [shape: f32[1,24,32], index: 6, kind: output, shape index: {}]  }
   0x1   :  { %v239_v0 = vld [vmem:[%s331_s2 + $0x8] sm:$0xff]  ;;  %v238_v1 = vld [vmem:[%s331_s2] sm:$0xff] }
   0x2   :  { %67 = vmatpush.bf16.msra.mxu0 %v239_v0  ;;  %v237_v2 = vld [vmem:[%s332_s0] sm:$0xff]  ;;  %v29_v3 = vld [vmem:[%s332_s0 + $0x8] sm:$0xf] }
   0x3   :  { %v39_v4 = vunpack.c.l.b16 %v29_v3  ;;  %v236_v12 = vld [vmem:[%s334_s1] sm:$0xff]  ;;  %v26_v14 = vld [vmem:[%s334_s1 + $0x8] sm:$0xf] }
   0x4   :  { %v90_v15 = vunpack.c.l.b16 %v26_v14  ;;  %v241_v17 = vld [vmem:[%s335_s4 + $0x8] sm:$0xff]  ;;  %v240_v18 = vld [vmem:[%s335_s4] sm:$0xff] }
   0x5   :  { %v41_v5 = vpack.c.b16 %v39_v4, %v39_v4  ;;  %155 = vmatpush.bf16.msra.mxu2 %v241_v17  ;;  %v242_v20 = vld [vmem:[%s333_s3] ss:$0 sm:$0xff] }
   0x6   :  { %68 = vmatpush.bf16.msra.mxu0 %v238_v1  ;;  %v92_v16 = vpack.c.b16 %v90_v15, %v90_v15  ;;  %v243_v39 = vld [vmem:[%s336_s5] ss:$0 sm:$0xff] }
   0x9   :  { %216 = vmatmul.msk.bf16.vlgmr.msra.gmra.mxu0 %vm54_vm0, %v237_v2  ;;  %156 = vmatpush.bf16.msra.mxu2 %v240_v18 }
  0x19   :  { %217 = vmatmul.msk.bf16.gmra.mxu0 %vm54_vm0, %v41_v5 }
  0x86   :  { %v70_v6 = vpop.f32.mrf.mxu0 }
  0x8e   :  { %v72_v7 = vpop.f32.mrf.mxu0 }
  0x8f   :  { %v79_v11 = vpack.c.bf16 %v72_v7, %v70_v6 }
  0x96   :  { %v75_v8 = vpop.f32.mrf.mxu0 }
  0x97   :  { %v80_v9 = vpack.c.bf16 %v75_v8, %v75_v8 }
  0x99   :  { %v102_v10 = vsel %vm100_vm1, %v80_v9, 0 }
  0x9a   :  { %110 = vmatpush.bf16.msra.mxu1 %v102_v10 }
  0x9e   :  { %v77_v13 = vpop.f32.mrf.mxu0  ;;  %111 = vmatpush.bf16.msra.mxu1 %v79_v11 }
  0xa1   :  { %222 = vmatmul.msk.bf16.vlgmr.msra.gmra.mxu1 %vm93_vm2, %v236_v12 }
  0xb1   :  { %223 = vmatmul.msk.bf16.gmra.mxu1 %vm93_vm2, %v92_v16 }
 0x11e   :  { %v113_v19 = vpop.f32.mrf.mxu1 }
 0x11f   :  { %v114_v21 = vadd.f32 %v242_v20, %v113_v19 }
 0x121   :  { %v122_v24 = vmax.f32 %v114_v21, 0.0 }
 0x126   :  { %v115_v22 = vpop.f32.mrf.mxu1 }
 0x127   :  { %v116_v23 = vadd.f32 %v242_v20, %v115_v22 }
 0x129   :  { %v123_v25 = vmax.f32 %v116_v23, 0.0 }
 0x12b   :  { %v125_v26 = vpack.c.bf16 %v123_v25, %v122_v24 }
 0x12d   :  { %232 = vmatmul.msk.bf16.vlgmr.msra.gmra.mxu2 %vm54_vm0, %v125_v26 }
 0x12e   :  { %v118_v27 = vpop.f32.mrf.mxu1 }
 0x12f   :  { %v119_v28 = vadd.f32 %v242_v20, %v118_v27 }
 0x131   :  { %v124_v29 = vmax.f32 %v119_v28, 0.0 }
 0x133   :  { %v126_v31 = vpack.c.bf16 %v124_v29, %v124_v29 }
 0x136   :  { %v120_v30 = vpop.f32.mrf.mxu1 }
 0x13d   :  { %233 = vmatmul.msk.bf16.gmra.mxu2 %vm54_vm0, %v126_v31 }
 0x1b0   :  { %v158_v32 = vpop.f32.mrf.mxu2 }
 0x1b8   :  { %v160_v33 = vpop.f32.mrf.mxu2 }
 0x1b9   :  { %v167_v37 = vpack.c.bf16 %v160_v33, %v158_v32 }
 0x1c0   :  { %v163_v34 = vpop.f32.mrf.mxu2 }
 0x1c1   :  { %v168_v35 = vpack.c.bf16 %v163_v34, %v163_v34 }
 0x1c3   :  { %v174_v36 = vsel %vm100_vm1, %v168_v35, 0 }
 0x1c4   :  { %182 = vmatpush.bf16.msra.mxu3 %v174_v36 }
 0x1c8   :  { %v165_v38 = vpop.f32.mrf.mxu2  ;;  %183 = vmatpush.bf16.msra.mxu3 %v167_v37 }
 0x1cb   :  { %234 = vmatmul.msk.bf16.vlgmr.msra.gmra.mxu3 %vm93_vm2, %v236_v12 }
 0x1db   :  { %235 = vmatmul.msk.bf16.gmra.mxu3 %vm93_vm2, %v92_v16 }
 0x24e   :  { %v185_v40 = vpop.f32.mrf.mxu3 }
 0x24f   :  { %v186_v41 = vadd.f32 %v243_v39, %v185_v40 }
 0x251   :  { %v194_v42 = vmax.f32 %v186_v41, 0.0 }
 0x253   :  { %197 = vst.msk [vmem:[%s337_s6] sm:$0xff] %vm54_vm0, %v194_v42 }
 0x256   :  { %v187_v43 = vpop.f32.mrf.mxu3 }
 0x257   :  { %v188_v44 = vadd.f32 %v243_v39, %v187_v43 }
 0x259   :  { %v195_v45 = vmax.f32 %v188_v44, 0.0 }
 0x25b   :  { %198 = vst.msk [vmem:[%s337_s6 + $0x8] sm:$0xff] %vm54_vm0, %v195_v45 }
 0x25e   :  { %v190_v46 = vpop.f32.mrf.mxu3 }
 0x25f   :  { %v191_v47 = vadd.f32 %v243_v39, %v190_v46 }
 0x261   :  { %v196_v48 = vmax.f32 %v191_v47, 0.0 }
 0x263   :  { %199 = vst.msk [vmem:[%s337_s6 + $0x10] sm:$0xff] %vm54_vm0, %v196_v48 }
 0x266   :  { %v192_v49 = vpop.f32.mrf.mxu3 }

</bundles_post_ra>
